<compile_context>
chip_gen: v7x
topology: tpu7x:2x2x1
jax: 0.10.0
libtpu: 0.0.40
codegen_flags: <defaults>
</compile_context>

<pallas_src>
import functools

import jax
import jax.numpy as jnp
from jax.experimental import pallas as pl
from jax.experimental.pallas import tpu as pltpu

LEAKY_SLOPE = 0.01  # torch.nn.LeakyReLU default negative_slope
LANE = 128


def _round_up(n: int, m: int) -> int:
    return ((n + m - 1) // m) * m


def make_nn_q_kernel(num_hidden_layers: int, out_size: int, out_pad: int, eps: float):
    """Kernel for one (tile_b, features) block: full MLP + softmax + zero fixup."""
    n_linear = num_hidden_layers + 1

    def kernel(x_ref, *refs):
        out_ref = refs[-1]
        param_refs = refs[:-1]  # interleaved: W0, b0, W1, b1, ...

        h = x_ref[...]  # bf16 activations feed the MXU
        for i in range(n_linear):
            w = param_refs[2 * i][...]          # bf16 (in_pad, out_pad_i)
            b = param_refs[2 * i + 1][...]      # f32  (1, out_pad_i)
            acc = jnp.dot(h, w, preferred_element_type=jnp.float32) + b
            if i < num_hidden_layers:
                acc = jnp.where(acc >= 0, acc, LEAKY_SLOPE * acc)  # LeakyReLU in f32
                h = acc.astype(jnp.bfloat16)
            else:
                h = acc  # final logits stay f32

        # Mask lane-padding columns of the output layer (exact: exp(-inf) == 0).
        if out_pad != out_size:
            col = jax.lax.broadcasted_iota(jnp.int32, h.shape, 1)
            valid = col < out_size
            h = jnp.where(valid, h, -jnp.inf)
        else:
            valid = None

        # Softmax over dim=1 (f32).
        m = jnp.max(h, axis=1, keepdims=True)
        e = jnp.exp(h - m)
        s = jnp.sum(e, axis=1, keepdims=True)
        # EUP approx reciprocal + one Newton-Raphson step: keeps the VALU free
        # while keeping |sum(proba) - 1| far below the module's 1e-4 assert.
        r = pl.reciprocal(s, approx=True)
        r = r * (2.0 - s * r)
        proba = e * r

        # Zero-probability fixup (branchless; rows without zeros get scale 1).
        zeroes = proba == 0.0
        if valid is not None:
            zeroes = jnp.logical_and(zeroes, valid)
        n_zero = jnp.sum(zeroes.astype(jnp.float32), axis=1, keepdims=True)
        proba = proba * (1.0 - n_zero * eps)
        proba = jnp.where(zeroes, proba + eps, proba)
        if valid is not None:
            proba = jnp.where(valid, proba, 0.0)

        out_ref[...] = proba

    return kernel


def init_nn_q_params(key, in_size, out_size, layers):
    """Deterministic init mimicking torch.nn.Linear default U(-1/sqrt(fan_in), 1/sqrt(fan_in))."""
    dims = [in_size] + list(layers) + [out_size]
    params = []
    for i in range(len(dims) - 1):
        fan_in, fan_out = dims[i], dims[i + 1]
        key, kw, kb = jax.random.split(key, 3)
        bound = 1.0 / jnp.sqrt(jnp.float32(fan_in))
        W = jax.random.uniform(kw, (fan_in, fan_out), jnp.float32, -bound, bound)
        b = jax.random.uniform(kb, (fan_out,), jnp.float32, -bound, bound)
        params.append((W, b))
    return params


@functools.partial(jax.jit, static_argnames=("eps", "tile_b"))
def nn_q_forward(x, params, eps=1e-3, tile_b=512):
    assert x.ndim == 2
    B, in_size = x.shape
    num_hidden = len(params) - 1
    out_size = params[-1][0].shape[1]

    # Feature dims: keep in_size as-is (full-block dim, avoids inflating x DMA),
    # pad hidden/output dims to lane multiples (zero padding is exact).
    dims = [in_size] + [W.shape[1] for W, _ in params]
    dims_pad = [in_size] + [_round_up(d, LANE) for d in dims[1:]]
    out_pad = dims_pad[-1]

    # Batch tiling: large tiles, multiple of 8 sublanes.
    tb = _round_up(min(tile_b, _round_up(B, 8)), 8)
    B_pad = _round_up(B, tb)
    grid = (B_pad // tb,)

    # bf16 activations / weights for the MXU; biases stay f32 (added post-matmul).
    x_p = x.astype(jnp.bfloat16)
    if B_pad != B:
        x_p = jnp.pad(x_p, ((0, B_pad - B), (0, 0)))

    flat_params = []
    for li, (W, b) in enumerate(params):
        din, dout = W.shape
        din_p, dout_p = dims_pad[li], dims_pad[li + 1]
        W_p = jnp.pad(W.astype(jnp.float32),
                      ((0, din_p - din), (0, dout_p - dout))).astype(jnp.bfloat16)
        b_p = jnp.pad(b.astype(jnp.float32), (0, dout_p - dout)).reshape(1, dout_p)
        flat_params.append(W_p)
        flat_params.append(b_p)

    kernel = make_nn_q_kernel(num_hidden, out_size, out_pad, eps)

    in_specs = [pl.BlockSpec((tb, in_size), lambda i: (i, 0))]
    for p in flat_params:  # weights/biases: constant index map -> VMEM-resident
        in_specs.append(pl.BlockSpec(p.shape, lambda i: (0, 0)))
    out_specs = pl.BlockSpec((tb, out_pad), lambda i: (i, 0))

    flops = 2 * B_pad * sum(dims_pad[i] * dims_pad[i + 1] for i in range(len(dims_pad) - 1))
    bytes_accessed = (x_p.size * x_p.dtype.itemsize
                      + sum(int(p.size) * p.dtype.itemsize for p in flat_params)
                      + B_pad * out_pad * 4)
    cost = pl.CostEstimate(flops=flops,
                           transcendentals=B_pad * out_pad,
                           bytes_accessed=bytes_accessed)

    out = pl.pallas_call(
        kernel,
        out_shape=jax.ShapeDtypeStruct((B_pad, out_pad), jnp.float32),
        grid=grid,
        in_specs=in_specs,
        out_specs=out_specs,
        compiler_params=pltpu.CompilerParams(
            dimension_semantics=("parallel",),     # shard batch grid across TCs (v7x)
            vmem_limit_bytes=32 * 1024 * 1024,
        ),
        cost_estimate=cost,
    )(x_p, *flat_params)

    return out[:B, :out_size]


if __name__ == "__main__":
    key = jax.random.PRNGKey(0)

    batch = 8
    in_size = 32
    layers = (64, 32)
    out_size = 16
    eps = 1e-3

    key, kx, kp = jax.random.split(key, 3)
    x = jax.random.normal(kx, (batch, in_size), jnp.float32)
    params = init_nn_q_params(kp, in_size, out_size, layers)

    proba = nn_q_forward(x, params, eps=eps)
    proba = jax.block_until_ready(proba)

    # Sanity checks mirroring the PyTorch asserts.
    row_sums = jnp.sum(proba, axis=1)
    assert proba.shape == (batch, out_size)
    assert bool(jnp.all(jnp.abs(row_sums - 1.0) < 1e-4))
    assert bool(jnp.all(jnp.isfinite(proba)))

    # Exercise the multi-tile grid path (batch padded to tiles, remainder rows sliced off).
    key, kx2 = jax.random.split(key)
    x_big = jax.random.normal(kx2, (200, in_size), jnp.float32)
    proba_big = jax.block_until_ready(nn_q_forward(x_big, params, eps=eps, tile_b=64))
    row_sums_big = jnp.sum(proba_big, axis=1)
    assert proba_big.shape == (200, out_size)
    assert bool(jnp.all(jnp.abs(row_sums_big - 1.0) < 1e-4))
    assert bool(jnp.all(jnp.isfinite(proba_big)))

    print("KERNEL_OK")
</pallas_src>

<mosaic_0001>
module attributes {stable_mosaic.version = 11 : i64} {
  func.func @kernel(%arg0: i32, %arg1: memref<8x32xbf16, #tpu.memory_space<vmem>>, %arg2: memref<32x128xbf16, #tpu.memory_space<vmem>>, %arg3: memref<1x128xf32, #tpu.memory_space<vmem>>, %arg4: memref<128x128xbf16, #tpu.memory_space<vmem>>, %arg5: memref<1x128xf32, #tpu.memory_space<vmem>>, %arg6: memref<128x128xbf16, #tpu.memory_space<vmem>>, %arg7: memref<1x128xf32, #tpu.memory_space<vmem>>, %arg8: memref<8x128xf32, #tpu.memory_space<vmem>>) attributes {dimension_semantics = [#tpu.dimension_semantics<parallel>], iteration_bounds = array<i64: 1>, scalar_prefetch = 0 : i64, scratch_operands = 0 : i64, tpu.core_type = #tpu.core_type<tc>, window_params = [{transform_indices = @transform_0, window_bounds = array<i64: 8, 32>}, {pipeline_mode = #tpu.pipeline_mode<synchronous>, transform_indices = @transform_1, window_bounds = array<i64: 32, 128>}, {pipeline_mode = #tpu.pipeline_mode<synchronous>, transform_indices = @transform_2, window_bounds = array<i64: 1, 128>}, {pipeline_mode = #tpu.pipeline_mode<synchronous>, transform_indices = @transform_3, window_bounds = array<i64: 128, 128>}, {pipeline_mode = #tpu.pipeline_mode<synchronous>, transform_indices = @transform_4, window_bounds = array<i64: 1, 128>}, {pipeline_mode = #tpu.pipeline_mode<synchronous>, transform_indices = @transform_5, window_bounds = array<i64: 128, 128>}, {pipeline_mode = #tpu.pipeline_mode<synchronous>, transform_indices = @transform_6, window_bounds = array<i64: 1, 128>}, {transform_indices = @transform_7, window_bounds = array<i64: 8, 128>}]} {
    %c0 = arith.constant 0 : index
    %c0_0 = arith.constant 0 : index
    %0 = vector.load %arg1[%c0, %c0_0] : memref<8x32xbf16, #tpu.memory_space<vmem>>, vector<8x32xbf16>
    %c0_1 = arith.constant 0 : index
    %c0_2 = arith.constant 0 : index
    %1 = vector.load %arg2[%c0_1, %c0_2] : memref<32x128xbf16, #tpu.memory_space<vmem>>, vector<32x128xbf16>
    %c0_3 = arith.constant 0 : index
    %c0_4 = arith.constant 0 : index
    %2 = vector.load %arg3[%c0_3, %c0_4] : memref<1x128xf32, #tpu.memory_space<vmem>>, vector<1x128xf32>
    %cst = arith.constant dense<0.000000e+00> : vector<8x128xf32>
    %3 = tpu.matmul %0, %1, %cst {dimension_numbers = #tpu.dot_dimension_numbers<[1], [0], [0], [1], [0, 0, 1, 1], [], []>} : vector<8x32xbf16>, vector<32x128xbf16>, vector<8x128xf32> -> vector<8x128xf32>
    %4 = vector.broadcast %2 : vector<1x128xf32> to vector<8x128xf32>
    %5 = arith.addf %3, %4 : vector<8x128xf32>
    %cst_5 = arith.constant 0.000000e+00 : f32
    %6 = vector.broadcast %cst_5 : f32 to vector<8x128xf32>
    %7 = arith.cmpf oge, %5, %6 : vector<8x128xf32>
    %cst_6 = arith.constant 0.00999999977 : f32
    %8 = vector.broadcast %cst_6 : f32 to vector<8x128xf32>
    %9 = arith.mulf %8, %5 : vector<8x128xf32>
    %10 = arith.select %7, %5, %9 : vector<8x128xi1>, vector<8x128xf32>
    %11 = arith.truncf %10 : vector<8x128xf32> to vector<8x128xbf16>
    %c0_7 = arith.constant 0 : index
    %c0_8 = arith.constant 0 : index
    %12 = vector.load %arg4[%c0_7, %c0_8] : memref<128x128xbf16, #tpu.memory_space<vmem>>, vector<128x128xbf16>
    %c0_9 = arith.constant 0 : index
    %c0_10 = arith.constant 0 : index
    %13 = vector.load %arg5[%c0_9, %c0_10] : memref<1x128xf32, #tpu.memory_space<vmem>>, vector<1x128xf32>
    %cst_11 = arith.constant dense<0.000000e+00> : vector<8x128xf32>
    %14 = tpu.matmul %11, %12, %cst_11 {dimension_numbers = #tpu.dot_dimension_numbers<[1], [0], [0], [1], [0, 0, 1, 1], [], []>} : vector<8x128xbf16>, vector<128x128xbf16>, vector<8x128xf32> -> vector<8x128xf32>
    %15 = vector.broadcast %13 : vector<1x128xf32> to vector<8x128xf32>
    %16 = arith.addf %14, %15 : vector<8x128xf32>
    %cst_12 = arith.constant 0.000000e+00 : f32
    %17 = vector.broadcast %cst_12 : f32 to vector<8x128xf32>
    %18 = arith.cmpf oge, %16, %17 : vector<8x128xf32>
    %cst_13 = arith.constant 0.00999999977 : f32
    %19 = vector.broadcast %cst_13 : f32 to vector<8x128xf32>
    %20 = arith.mulf %19, %16 : vector<8x128xf32>
    %21 = arith.select %18, %16, %20 : vector<8x128xi1>, vector<8x128xf32>
    %22 = arith.truncf %21 : vector<8x128xf32> to vector<8x128xbf16>
    %c0_14 = arith.constant 0 : index
    %c0_15 = arith.constant 0 : index
    %23 = vector.load %arg6[%c0_14, %c0_15] : memref<128x128xbf16, #tpu.memory_space<vmem>>, vector<128x128xbf16>
    %c0_16 = arith.constant 0 : index
    %c0_17 = arith.constant 0 : index
    %24 = vector.load %arg7[%c0_16, %c0_17] : memref<1x128xf32, #tpu.memory_space<vmem>>, vector<1x128xf32>
    %cst_18 = arith.constant dense<0.000000e+00> : vector<8x128xf32>
    %25 = tpu.matmul %22, %23, %cst_18 {dimension_numbers = #tpu.dot_dimension_numbers<[1], [0], [0], [1], [0, 0, 1, 1], [], []>} : vector<8x128xbf16>, vector<128x128xbf16>, vector<8x128xf32> -> vector<8x128xf32>
    %26 = vector.broadcast %24 : vector<1x128xf32> to vector<8x128xf32>
    %27 = arith.addf %25, %26 : vector<8x128xf32>
    %28 = tpu.iota {dimensions = array<i32: 1>} : vector<8x128xi32>
    %c16_i32 = arith.constant 16 : i32
    %29 = vector.broadcast %c16_i32 : i32 to vector<8x128xi32>
    %30 = arith.cmpi slt, %28, %29 : vector<8x128xi32>
    %cst_19 = arith.constant 0xFF800000 : f32
    %31 = vector.broadcast %cst_19 : f32 to vector<8x128xf32>
    %32 = arith.select %30, %27, %31 : vector<8x128xi1>, vector<8x128xf32>
    %cst_20 = arith.constant dense<0xFF800000> : vector<8xf32>
    %33 = vector.multi_reduction <maximumf>, %32, %cst_20 [1] : vector<8x128xf32> to vector<8xf32>
    %34 = vector.shape_cast %33 : vector<8xf32> to vector<8x1xf32>
    %35 = vector.broadcast %34 : vector<8x1xf32> to vector<8x128xf32>
    %36 = arith.subf %32, %35 : vector<8x128xf32>
    %37 = math.exp %36 : vector<8x128xf32>
    %cst_21 = arith.constant dense<0.000000e+00> : vector<8xf32>
    %38 = vector.multi_reduction <add>, %37, %cst_21 [1] : vector<8x128xf32> to vector<8xf32>
    %39 = vector.shape_cast %38 : vector<8xf32> to vector<8x1xf32>
    %40 = tpu.reciprocal %39 {approx = true} : vector<8x1xf32> -> vector<8x1xf32>
    %41 = arith.mulf %39, %40 : vector<8x1xf32>
    %cst_22 = arith.constant 2.000000e+00 : f32
    %42 = vector.broadcast %cst_22 : f32 to vector<8x1xf32>
    %43 = arith.subf %42, %41 : vector<8x1xf32>
    %44 = arith.mulf %40, %43 : vector<8x1xf32>
    %45 = vector.broadcast %44 : vector<8x1xf32> to vector<8x128xf32>
    %46 = arith.mulf %37, %45 : vector<8x128xf32>
    %cst_23 = arith.constant 0.000000e+00 : f32
    %47 = vector.broadcast %cst_23 : f32 to vector<8x128xf32>
    %48 = arith.cmpf oeq, %46, %47 : vector<8x128xf32>
    %49 = arith.andi %48, %30 : vector<8x128xi1>
    %50 = arith.extui %49 : vector<8x128xi1> to vector<8x128xi32>
    %51 = arith.sitofp %50 : vector<8x128xi32> to vector<8x128xf32>
    %cst_24 = arith.constant dense<0.000000e+00> : vector<8xf32>
    %52 = vector.multi_reduction <add>, %51, %cst_24 [1] : vector<8x128xf32> to vector<8xf32>
    %53 = vector.shape_cast %52 : vector<8xf32> to vector<8x1xf32>
    %cst_25 = arith.constant 1.000000e-03 : f32
    %54 = vector.broadcast %cst_25 : f32 to vector<8x1xf32>
    %55 = arith.mulf %53, %54 : vector<8x1xf32>
    %cst_26 = arith.constant 1.000000e+00 : f32
    %56 = vector.broadcast %cst_26 : f32 to vector<8x1xf32>
    %57 = arith.subf %56, %55 : vector<8x1xf32>
    %58 = vector.broadcast %57 : vector<8x1xf32> to vector<8x128xf32>
    %59 = arith.mulf %46, %58 : vector<8x128xf32>
    %cst_27 = arith.constant 1.000000e-03 : f32
    %60 = vector.broadcast %cst_27 : f32 to vector<8x128xf32>
    %61 = arith.addf %59, %60 : vector<8x128xf32>
    %62 = arith.select %49, %61, %59 : vector<8x128xi1>, vector<8x128xf32>
    %cst_28 = arith.constant 0.000000e+00 : f32
    %63 = vector.broadcast %cst_28 : f32 to vector<8x128xf32>
    %64 = arith.select %30, %62, %63 : vector<8x128xi1>, vector<8x128xf32>
    %c0_29 = arith.constant 0 : index
    %c0_30 = arith.constant 0 : index
    %65 = vector.load %arg8[%c0_29, %c0_30] : memref<8x128xf32, #tpu.memory_space<vmem>>, vector<8x128xf32>
    tpu.vector_store %arg8[%c0_29, %c0_30], %64 {strides = array<i32>} : memref<8x128xf32, #tpu.memory_space<vmem>>, vector<8x128xf32>,
    return
  }
  func.func @transform_0(%arg0: i32) -> (i32, i32) {
    %c0_i32 = arith.constant 0 : i32
    %c0_i32_0 = arith.constant 0 : i32
    return %arg0, %c0_i32 : i32, i32
  }
  func.func @transform_1(%arg0: i32) -> (i32, i32) {
    %c0_i32 = arith.constant 0 : i32
    %c0_i32_0 = arith.constant 0 : i32
    %c0_i32_1 = arith.constant 0 : i32
    return %c0_i32, %c0_i32_0 : i32, i32
  }
  func.func @transform_2(%arg0: i32) -> (i32, i32) {
    %c0_i32 = arith.constant 0 : i32
    %c0_i32_0 = arith.constant 0 : i32
    %c0_i32_1 = arith.constant 0 : i32
    return %c0_i32, %c0_i32_0 : i32, i32
  }
  func.func @transform_3(%arg0: i32) -> (i32, i32) {
    %c0_i32 = arith.constant 0 : i32
    %c0_i32_0 = arith.constant 0 : i32
    %c0_i32_1 = arith.constant 0 : i32
    return %c0_i32, %c0_i32_0 : i32, i32
  }
  func.func @transform_4(%arg0: i32) -> (i32, i32) {
    %c0_i32 = arith.constant 0 : i32
    %c0_i32_0 = arith.constant 0 : i32
    %c0_i32_1 = arith.constant 0 : i32
    return %c0_i32, %c0_i32_0 : i32, i32
  }
  func.func @transform_5(%arg0: i32) -> (i32, i32) {
    %c0_i32 = arith.constant 0 : i32
    %c0_i32_0 = arith.constant 0 : i32
    %c0_i32_1 = arith.constant 0 : i32
    return %c0_i32, %c0_i32_0 : i32, i32
  }
  func.func @transform_6(%arg0: i32) -> (i32, i32) {
    %c0_i32 = arith.constant 0 : i32
    %c0_i32_0 = arith.constant 0 : i32
    %c0_i32_1 = arith.constant 0 : i32
    return %c0_i32, %c0_i32_0 : i32, i32
  }
  func.func @transform_7(%arg0: i32) -> (i32, i32) {
    %c0_i32 = arith.constant 0 : i32
    %c0_i32_0 = arith.constant 0 : i32
    return %arg0, %c0_i32 : i32, i32
  }
}

</mosaic_0001>

<bundles_post_ra>
// kernel: nn_q_forward.1
= control target key start
LH: loop header
LB: loop body
LE: loop exit
PB: predicated region body
PF: predicated region fallthrough
CT: control target
= control target key end

     0   :  { %v510_v1 = vmov 0.0   ;;  %vm511_vm0 = vmmov 0   ;;  %vm52_vm1 = vcmask 261120   ;;  %s659_s0 = inlined_call_operand.vmem [shape: bf16[8,32], index: 0, kind: input, shape index: {}]   ;;  %s660_s1 = inlined_call_operand.vmem [shape: bf16[32,128], index: 1, kind: input, shape index: {}]   ;;  %s661_s2 = inlined_call_operand.vmem [shape: f32[1,128], index: 2, kind: input, shape index: {}]   ;;  %s662_s3 = inlined_call_operand.vmem [shape: bf16[128,128], index: 3, kind: input, shape index: {}]   ;;  %s663_s4 = inlined_call_operand.vmem [shape: f32[1,128], index: 4, kind: input, shape index: {}]   ;;  %s664_s5 = inlined_call_operand.vmem [shape: bf16[128,128], index: 5, kind: input, shape index: {}]   ;;  %s665_s6 = inlined_call_operand.vmem [shape: f32[1,128], index: 6, kind: input, shape index: {}]   ;;  %s666_s7 = inlined_call_operand.hbm [shape: f32[8,128], index: 7, kind: output, shape index: {}]  }
   0x1   :  { %v464_v0 = vld [vmem:[%s660_s1] sm:$0xff]   ;;  %413 = vmatprep.subr.bf16.mxu0 %v510_v1  ;;  %421 = vmatprep.subr.bf16.mxu1 %v510_v1  ;;  %v465_v2 = vld [vmem:[%s660_s1 + $0x8] sm:$0xff]   ;;  %v468_v6 = vld [vmem:[%s662_s3 + $0x10] sm:$0xff]  }
   0x2   :  { %414 = vmatpush3.bf16.msra.mxu0 %v464_v0  ;;  %417 = vmatprep.mubr.msk.bf16.mxu0 %vm511_vm0, %v510_v1  ;;  %v466_v3 = vld [vmem:[%s662_s3] sm:$0xff]   ;;  %v467_v4 = vld [vmem:[%s662_s3 + $0x8] sm:$0xff]   ;;  %v469_v7 = vld [vmem:[%s662_s3 + $0x18] sm:$0xff]  }
   0x3   :  { %415 = vmatprep.subr.bf16.mxu0 %v510_v1  ;;  %437 = vmatprep.mubr.msk.bf16.mxu1 %vm511_vm0, %v510_v1  ;;  %v28_v5 = vld [vmem:[%s659_s0] sm:$0xf] }
   0x4   :  { %422 = vmatpush3.bf16.msra.mxu1 %v466_v3 }
   0x5   :  { %423 = vmatprep.subr.bf16.mxu1 %v510_v1 }
   0x6   :  { %416 = vmatpush3.bf16.msra.mxu0 %v465_v2 }
   0x7   :  { %441 = vmatprep.subr.bf16.mxu0 %v510_v1 }
   0x8   :  { %424 = vmatpush3.bf16.msra.mxu1 %v467_v4 }
   0x9   :  { %418 = vmatmul.mubr.msk.bf16.vlgmr.msra.gmra.mrb[0].mxu0 %vm52_vm1, %v28_v5  ;;  %425 = vmatprep.subr.bf16.mxu1 %v510_v1 }
   0xa   :  { %457 = vmatprep.mubr.msk.bf16.mxu0 %vm511_vm0, %v510_v1 }
   0xc   :  { %426 = vmatpush3.bf16.msra.mxu1 %v468_v6 }
   0xd   :  { %427 = vmatprep.subr.bf16.mxu1 %v510_v1 }
   0xe   :  { %12 = vsyncpa [#allocation3], 0  ;;  %v470_v8 = vld [vmem:[%s662_s3 + $0x20] sm:$0xff]   ;;  %v471_v9 = vld [vmem:[%s662_s3 + $0x28] sm:$0xff]   ;;  %v326_v38 = vlaneseq }
   0xf   :  { %v472_v10 = vld [vmem:[%s662_s3 + $0x30] sm:$0xff]   ;;  %v473_v11 = vld [vmem:[%s662_s3 + $0x38] sm:$0xff]   ;;  %v474_v12 = vld [vmem:[%s664_s5] sm:$0xff]  }
  0x10   :  { %428 = vmatpush3.bf16.msra.mxu1 %v469_v7  ;;  %442 = vmatpush3.bf16.msra.mxu0 %v474_v12  ;;  %v475_v13 = vld [vmem:[%s664_s5 + $0x8] sm:$0xff]   ;;  %v476_v14 = vld [vmem:[%s664_s5 + $0x10] sm:$0xff]   ;;  %v477_v15 = vld [vmem:[%s664_s5 + $0x18] sm:$0xff]   ;;  %v327_v39 = vand.u32 127, %v326_v38 }
  0x11   :  { %429 = vmatprep.subr.bf16.mxu1 %v510_v1  ;;  %443 = vmatprep.subr.bf16.mxu0 %v510_v1  ;;  %v478_v16 = vld [vmem:[%s664_s5 + $0x20] sm:$0xff]   ;;  %v479_v17 = vld [vmem:[%s664_s5 + $0x28] sm:$0xff]   ;;  %v480_v27 = vld [vmem:[%s664_s5 + $0x30] sm:$0xff]  }
  0x12   :  { %v369_v18 = vld [vmem:[%s661_s2] ss:$0 sm:$0xff]  ;;  %v481_v28 = vld [vmem:[%s664_s5 + $0x38] sm:$0xff]   ;;  %vm328_vm4 = vcmp.lt.s32.totalorder %v327_v39, 16 }
  0x13   :  { %v373_v29 = vld [vmem:[%s663_s4] ss:$0 sm:$0xff]  ;;  %s512_s4 = smov [#allocation2]  }
  0x14   :  { %430 = vmatpush3.bf16.msra.mxu1 %v470_v8  ;;  %444 = vmatpush3.bf16.msra.mxu0 %v475_v13  ;;  %v382_v40 = vld [vmem:[%s665_s6] ss:$0 sm:$0xff]  ;;  %s361_s5 = sshll.u32 %s512_s4, 4  ;;  %s362_s5 = int_to_ptr.vmem [resolvable:$true] %s361_s5 }
  0x15   :  { %431 = vmatprep.subr.bf16.mxu1 %v510_v1  ;;  %445 = vmatprep.subr.bf16.mxu0 %v510_v1  ;;  %s486_s6 = scalar_lea.vmem %s362_s5, 128  ;;  %p491_p1 = scmp.lt.s32.totalorder %s362_s5, %s362_s5 }
  0x16   :  { %p487_p0 = scmp.ne.s32.totalorder %s362_s5, %s486_s6  ;;  %p492_p2 = scmp.lt.s32.totalorder %s486_s6, %s486_s6 }
  0x18   :  { %432 = vmatpush3.bf16.msra.mxu1 %v471_v9  ;;  %446 = vmatpush3.bf16.msra.mxu0 %v476_v14  ;;  %p493_p3 = por %p492_p2, %p491_p1 }
  0x19   :  { %433 = vmatprep.subr.bf16.mxu1 %v510_v1  ;;  %447 = vmatprep.subr.bf16.mxu0 %v510_v1 }
  0x1a   :  { %p494_p4 = pnand %p493_p3, %p487_p0 }
  0x1c   :  { %434 = vmatpush3.bf16.msra.mxu1 %v472_v10  ;;  %448 = vmatpush3.bf16.msra.mxu0 %v477_v15 }
  0x1d   :  { %435 = vmatprep.subr.bf16.mxu1 %v510_v1  ;;  %449 = vmatprep.subr.bf16.mxu0 %v510_v1 }
  0x20   :  { %436 = vmatpush3.bf16.msra.mxu1 %v473_v11  ;;  %450 = vmatpush3.bf16.msra.mxu0 %v478_v16 }
  0x21   :  { %451 = vmatprep.subr.bf16.mxu0 %v510_v1 }
  0x24   :  { %452 = vmatpush3.bf16.msra.mxu0 %v479_v17 }
  0x25   :  { %453 = vmatprep.subr.bf16.mxu0 %v510_v1 }
  0x28   :  { %454 = vmatpush3.bf16.msra.mxu0 %v480_v27 }
  0x29   :  { %455 = vmatprep.subr.bf16.mxu0 %v510_v1 }
  0x2c   :  { %456 = vmatpush3.bf16.msra.mxu0 %v481_v28 }
  0xdc   :  { %v90_v19 = vpop.f32.mrb[0].mxu0 }
  0xdd   :  { %v91_v20 = vadd.f32 %v369_v18, %v90_v19  ;;  %v419_v21 = vpop.f32.mrb[1].mxu0 }
  0xde   :  { %v93_v22 = vpop.f32.mrb[2].mxu0 }
  0xdf   :  { %vm96_vm2 = vcmp.ge.f32.partialorder %v91_v20, 0.0  ;;  %v97_v23 = vmul.f32 0.01, %v91_v20  ;;  %v420_v24 = vpop.f32.mrb[3].mxu0 }
  0xe1   :  { %v98_v25 = vsel %vm96_vm2, %v91_v20, %v97_v23 }
  0xe2   :  { %v99_v26 = vpack.c.bf16 %v98_v25, %v98_v25 }
  0xe4   :  { %438 = vmatmul.mubr.bf16.vlgmr.msra.gmra.mrb[0].mxu1 %v99_v26 }
 0x1b7   :  { %v205_v30 = vpop.f32.mrb[0].mxu1 }
 0x1b8   :  { %v206_v31 = vadd.f32 %v373_v29, %v205_v30  ;;  %v439_v32 = vpop.f32.mrb[1].mxu1 }
 0x1b9   :  { %v208_v33 = vpop.f32.mrb[2].mxu1 }
 0x1ba   :  { %vm211_vm3 = vcmp.ge.f32.partialorder %v206_v31, 0.0  ;;  %v212_v34 = vmul.f32 0.01, %v206_v31  ;;  %v440_v35 = vpop.f32.mrb[3].mxu1 }
 0x1bc   :  { %v213_v36 = vsel %vm211_vm3, %v206_v31, %v212_v34 }
 0x1bd   :  { %v214_v37 = vpack.c.bf16 %v213_v36, %v213_v36 }
 0x1bf   :  { %458 = vmatmul.mubr.bf16.vlgmr.msra.gmra.mrb[4].mxu0 %v214_v37 }
 0x292   :  { %v320_v41 = vpop.f32.mrb[4].mxu0 }
 0x293   :  { %v321_v42 = vadd.f32 %v382_v40, %v320_v41  ;;  %v459_v43 = vpop.f32.mrb[5].mxu0 }
 0x294   :  { %v323_v44 = vpop.f32.mrb[6].mxu0 }
 0x295   :  { %v460_v45 = vpop.f32.mrb[7].mxu0  ;;  %v329_v46 = vsel %vm328_vm4, %v321_v42, -inf }
 0x296   :  { %330 = vmax.xlane.f32.xlu0 %v329_v46 }
 0x323   :  { %v331_v47 = vpop.xlane.xlu0 %330 }
 0x324   :  { %v332_v48 = vsub.f32 %v329_v46, %v331_v47 }
 0x326   :  { %v333_v49 = vmul.f32 1.442695, %v332_v48 }
 0x328   :  { %482 = vpow2.f32 %v333_v49 }
 0x332   :  { %v483_v50 = vpop.eup %482 }
 0x333   :  { %335 = vadd.xlane.f32.xlu0 %v483_v50 }
 0x3c0   :  { %v336_v51 = vpop.xlane.xlu0 %335 }
 0x3c1   :  { %484 = vrcp.f32 %v336_v51 }
 0x3cb   :  { %v485_v52 = vpop.eup %484 }
 0x3cc   :  { %v338_v53 = vmul.f32 %v485_v52, %v336_v51 }
 0x3ce   :  { %v339_v54 = vsub.f32 2.0, %v338_v53 }
 0x3d0   :  { %v340_v55 = vmul.f32 %v485_v52, %v339_v54 }
 0x3d2   :  { %v341_v56 = vmul.f32 %v483_v50, %v340_v55 }
 0x3d4   :  { %vm342_vm5 = vcmp.eq.f32.partialorder %v341_v56, 0.0 }
 0x3d5   :  { %vm343_vm6 = vmand %vm342_vm5, %vm328_vm4 }
 0x3d6   :  { %v391_v57 = vsel %vm343_vm6, 1.0, %v510_v1 }
 0x3d7   :  { %346 = vadd.xlane.f32.xlu1 %v391_v57 }
 0x464   :  { %v347_v58 = vpop.xlane.xlu1 %346 }
 0x465   :  { %v348_v59 = vmul.f32 0.001, %v347_v58 }
 0x467   :  { %v349_v60 = vsub.f32 1.0, %v348_v59 }
 0x469   :  { %v350_v61 = vmul.f32 %v349_v60, %v341_v56 }
 0x46b   :  { %v351_v62 = vadd.f32 0.001, %v350_v61 }
 0x46d   :  { %v352_v63 = vsel %vm343_vm6, %v351_v62, %v350_v61 }
 0x46e   :  { %v353_v0 = vsel %vm328_vm4, %v352_v63, 0.0 }
 0x46f   :  { %354 = vst [vmem:[#allocation2] sm:$0xff] %v353_v0 }
 0x470   :  { %497 = shalt.err (!%p494_p4)
}
 0x471   :  { %s498_s18 = scalar_lea.hbm %s666_s7, 128 }
 0x472   :  { %p499_p5 = scmp.ne.s32.totalorder %s666_s7, %s498_s18  ;;  %p502_p6 = scmp.lt.u32.totalorder %s498_s18, %s666_s7 }
 0x474   :  { %p504_p7 = pnand %p502_p6, %p499_p5 }
 0x476   :  { %507 = shalt.err (!%p504_p7)
}
 0x477   :  { %364 = dma.vmem_to_hbm [thread:$0]  %s362_s5, 128, %s666_s7, [#allocation3]  }
 0x478   :  { %508 = dma.done.wait [#allocation3], 128  }
 0x479   :  { %509 = vsyncadd [#allocation3], 4294967168 }
 0x47a   :  { %368 = vsyncpa [#allocation3], 1 }

</bundles_post_ra>
